<compile_context>
chip_gen: v6e
topology: v6e:2x2x1
jax: 0.10.0
libtpu: 0.0.40
codegen_flags: <defaults>
</compile_context>

<pallas_src>
import functools

import jax
import jax.numpy as jnp
from jax.experimental import pallas as pl
from jax.experimental.pallas import tpu as pltpu


def _round_up(x, m):
    return ((x + m - 1) // m) * m


def _cdiv(a, b):
    return -(-a // b)


def _pow(x, gamma):
    """x ** gamma for x >= 0 without jnp.power (exp+log on EUP) when possible."""
    g = float(gamma)
    if g == 1.0:
        return x
    if g == float(int(g)) and 1.0 <= g <= 8.0:                # small integer exponent
        r = x
        for _ in range(int(g) - 1):
            r = r * x
        return r
    if 2.0 * g == float(int(2.0 * g)) and 0.0 < g <= 8.0:     # half-integer exponent
        r = jnp.sqrt(x)
        for _ in range(int(g - 0.5)):
            r = r * x
        return r
    return jnp.power(x, g)


def _bg_sum_kernel(prob_ref, out_ref, *, gamma, rows_valid):
    """Partial sum of p^gamma * -clamp(log(1-p), -100) over one lane-dense block."""
    tile_rows = prob_ref.shape[0]
    p = prob_ref[...]                                          # (tile_rows, 128) f32

    # Mask rows past the end of the flattened array BEFORE the log so garbage
    # in the ragged last block can never turn into NaN (NaN * 0 = NaN).
    row = (jax.lax.broadcasted_iota(jnp.int32, p.shape, 0)
           + pl.program_id(0) * tile_rows)
    p = jnp.where(row < rows_valid, p, 0.0)

    log_1mp = jnp.maximum(jnp.log(1.0 - p), -100.0)
    partial = jnp.sum(_pow(p, gamma) * (-log_1mp))

    # Scalar partial goes into element [0, 0] of this program's lane-aligned
    # (8, 128) output block (rest zeros); the wrapper sums the partials.
    sub = jax.lax.broadcasted_iota(jnp.int32, out_ref.shape, 1)
    lane = jax.lax.broadcasted_iota(jnp.int32, out_ref.shape, 2)
    out_ref[...] = jnp.where((sub == 0) & (lane == 0), partial, 0.0)


def task_aligned_focal_loss(prob, target, alignment_metric,
                            gamma=2.0, loss_weight=1.0, max_tile_rows=2048):
    """prob: (N, C) float in [0, 1]; target: (N,) int in [0, C] (C = background);
    alignment_metric: (N,) float.  Returns scalar mean loss * loss_weight
    (the weight=None, avg_factor=None, reduction='mean' path of the module)."""
    # TODO(synk): reduction='none'/'sum', per-prediction `weight` and
    # `avg_factor` overrides of the module are not implemented here.
    N, C = prob.shape
    gamma = float(gamma)

    prob_f = prob.astype(jnp.float32)
    align = alignment_metric.astype(jnp.float32)
    tgt = target.astype(jnp.int32)

    # ---------- O(N*C): lane-dense background sum via the Pallas kernel ------
    flat = prob_f.reshape(-1)                  # free reshape of a row-major array
    total = N * C
    pad = (-total) % 128
    if pad:
        # <=127 zero elements; zeros contribute exactly 0 loss.
        flat = jnp.pad(flat, (0, pad))
    rows = (total + pad) // 128
    mat = flat.reshape(rows, 128)              # lane-dense 2-D view

    if rows <= max_tile_rows:
        tile_rows, grid = rows, 1              # block == full array dims (allowed)
    else:
        nblk = _cdiv(rows, max_tile_rows)
        nblk += nblk % 2                       # even block count -> balanced 2-TC split
        tile_rows = _round_up(_cdiv(rows, nblk), 8)
        grid = _cdiv(rows, tile_rows)

    kernel = functools.partial(_bg_sum_kernel, gamma=gamma, rows_valid=rows)

    partials = pl.pallas_call(
        kernel,
        out_shape=jax.ShapeDtypeStruct((grid, 8, 128), jnp.float32),
        grid_spec=pltpu.PrefetchScalarGridSpec(
            num_scalar_prefetch=0,
            grid=(grid,),
            in_specs=[pl.BlockSpec((tile_rows, 128), lambda i: (i, 0))],
            out_specs=pl.BlockSpec((1, 8, 128), lambda i: (i, 0, 0)),
        ),
        compiler_params=pltpu.CompilerParams(
            # Independent row blocks -> megacore / 2-TC (v7x) can split the grid.
            dimension_semantics=("parallel",),
            # 1 MiB/buffer input (tile_rows<=2048) + a few MiB of temporaries;
            # 32 MiB is safe on v5e / v6e / v7x.
            vmem_limit_bytes=32 * 1024 * 1024,
        ),
    )(mat)
    bg_sum = jnp.sum(partials)                 # tiny cross-block reduction

    # ---------- O(N): per-row target-column correction in plain XLA ----------
    has_fg = tgt < C                           # target == C is background
    t_safe = jnp.where(has_fg, tgt, 0)
    p_t = jnp.take_along_axis(prob_f, t_safe[:, None], axis=1)[:, 0]      # (N,)
    log_p_t = jnp.maximum(jnp.log(p_t), -100.0)
    log_1mp_t = jnp.maximum(jnp.log(1.0 - p_t), -100.0)
    fg = _pow(jnp.abs(align - p_t), gamma) * (
        -(align * log_p_t + (1.0 - align) * log_1mp_t))
    bg_t = _pow(p_t, gamma) * (-log_1mp_t)     # same formula as the kernel's bg term
    corr_sum = jnp.sum(jnp.where(has_fg, fg - bg_t, 0.0))

    return (float(loss_weight) / float(N * C)) * (bg_sum + corr_sum)


def _reference(prob, target, alignment_metric, gamma=2.0, loss_weight=1.0):
    """Pure-JAX transcription of the PyTorch module (mean reduction)."""
    N, C = prob.shape
    one_hot = jax.nn.one_hot(target, C + 1, dtype=jnp.float32)[:, :-1]
    soft = alignment_metric[:, None] * one_hot
    log_p = jnp.maximum(jnp.log(prob), -100.0)
    log_1mp = jnp.maximum(jnp.log(1.0 - prob), -100.0)
    ce = -(soft * log_p + (1.0 - soft) * log_1mp)
    loss = jnp.abs(soft - prob) ** gamma * ce
    return loss_weight * jnp.mean(loss)


if __name__ == "__main__":
    key = jax.random.PRNGKey(0)
    k1, k2, k3 = jax.random.split(key, 3)

    # N predictions, C foreground classes (class id C == background).
    # N*C = 1540 is not a multiple of 128 -> exercises the <=127-element pad.
    N, C = 77, 20
    logits = jax.random.normal(k1, (N, C), dtype=jnp.float32)
    prob = jax.nn.sigmoid(logits)
    target = jax.random.randint(k2, (N,), 0, C + 1, dtype=jnp.int32)
    alignment_metric = jax.random.uniform(k3, (N,), dtype=jnp.float32)

    ref = _reference(prob, target, alignment_metric, gamma=2.0, loss_weight=1.0)

    # Default config: single lane-dense block.
    loss = jax.block_until_ready(
        task_aligned_focal_loss(prob, target, alignment_metric,
                                gamma=2.0, loss_weight=1.0))
    assert jnp.allclose(loss, ref, rtol=5e-5, atol=1e-6), (loss, ref)

    # Force a multi-block grid: exercises the in-kernel ragged-row masking and
    # the balanced even block split used for v7x's two TensorCores.
    loss_mb = jax.block_until_ready(
        task_aligned_focal_loss(prob, target, alignment_metric,
                                gamma=2.0, loss_weight=1.0, max_tile_rows=8))
    assert jnp.allclose(loss_mb, ref, rtol=5e-5, atol=1e-6), (loss_mb, ref)

    print("KERNEL_OK")
</pallas_src>

<mosaic_0001>
module attributes {stable_mosaic.version = 11 : i64} {
  func.func @_bg_sum_kernel(%arg0: i32, %arg1: memref<13x128xf32, #tpu.memory_space<vmem>>, %arg2: memref<1x8x128xf32, #tpu.memory_space<vmem>>) attributes {dimension_semantics = [#tpu.dimension_semantics<parallel>], iteration_bounds = array<i64: 1>, scalar_prefetch = 0 : i64, scratch_operands = 0 : i64, tpu.core_type = #tpu.core_type<tc>, window_params = [{transform_indices = @transform_0, window_bounds = array<i64: 13, 128>}, {transform_indices = @transform_1, window_bounds = array<i64: 1, 8, 128>}]} {
    %c0 = arith.constant 0 : index
    %c0_0 = arith.constant 0 : index
    %0 = vector.load %arg1[%c0, %c0_0] : memref<13x128xf32, #tpu.memory_space<vmem>>, vector<13x128xf32>
    %1 = tpu.iota {dimensions = array<i32: 0>} : vector<13x128xi32>
    %c13_i32 = arith.constant 13 : i32
    %2 = arith.muli %arg0, %c13_i32 : i32
    %3 = vector.broadcast %2 : i32 to vector<13x128xi32>
    %4 = arith.addi %1, %3 : vector<13x128xi32>
    %c13_i32_1 = arith.constant 13 : i32
    %5 = vector.broadcast %c13_i32_1 : i32 to vector<13x128xi32>
    %6 = arith.cmpi slt, %4, %5 : vector<13x128xi32>
    %cst = arith.constant 0.000000e+00 : f32
    %7 = vector.broadcast %cst : f32 to vector<13x128xf32>
    %8 = arith.select %6, %0, %7 : vector<13x128xi1>, vector<13x128xf32>
    %cst_2 = arith.constant 1.000000e+00 : f32
    %9 = vector.broadcast %cst_2 : f32 to vector<13x128xf32>
    %10 = arith.subf %9, %8 : vector<13x128xf32>
    %11 = math.log %10 : vector<13x128xf32>
    %cst_3 = arith.constant -1.000000e+02 : f32
    %12 = vector.broadcast %cst_3 : f32 to vector<13x128xf32>
    %13 = arith.maximumf %11, %12 : vector<13x128xf32>
    %14 = arith.mulf %8, %8 : vector<13x128xf32>
    %cst_4 = arith.constant 0.000000e+00 : f32
    %15 = vector.broadcast %cst_4 : f32 to vector<13x128xf32>
    %16 = arith.subf %15, %13 : vector<13x128xf32>
    %17 = arith.mulf %14, %16 : vector<13x128xf32>
    %18 = vector.shape_cast %17 : vector<13x128xf32> to vector<1x13x128xf32>
    %cst_5 = arith.constant dense<0.000000e+00> : vector<1xf32>
    %19 = vector.multi_reduction <add>, %18, %cst_5 [1, 2] : vector<1x13x128xf32> to vector<1xf32>
    %20 = vector.shape_cast %19 : vector<1xf32> to vector<1x1x1xf32>
    %21 = vector.extract %20[0, 0, 0] : f32 from vector<1x1x1xf32>
    %22 = tpu.iota {dimensions = array<i32: 1>} : vector<1x8x128xi32>
    %23 = tpu.iota {dimensions = array<i32: 2>} : vector<1x8x128xi32>
    %c0_i32 = arith.constant 0 : i32
    %24 = vector.broadcast %c0_i32 : i32 to vector<1x8x128xi32>
    %25 = arith.cmpi eq, %22, %24 : vector<1x8x128xi32>
    %c0_i32_6 = arith.constant 0 : i32
    %26 = vector.broadcast %c0_i32_6 : i32 to vector<1x8x128xi32>
    %27 = arith.cmpi eq, %23, %26 : vector<1x8x128xi32>
    %28 = arith.andi %25, %27 : vector<1x8x128xi1>
    %cst_7 = arith.constant 0.000000e+00 : f32
    %29 = vector.broadcast %21 : f32 to vector<1x8x128xf32>
    %30 = vector.broadcast %cst_7 : f32 to vector<1x8x128xf32>
    %31 = arith.select %28, %29, %30 : vector<1x8x128xi1>, vector<1x8x128xf32>
    %c0_8 = arith.constant 0 : index
    %c0_9 = arith.constant 0 : index
    %c0_10 = arith.constant 0 : index
    %32 = vector.load %arg2[%c0_8, %c0_9, %c0_10] : memref<1x8x128xf32, #tpu.memory_space<vmem>>, vector<1x8x128xf32>
    tpu.vector_store %arg2[%c0_8, %c0_9, %c0_10], %31 {strides = array<i32>} : memref<1x8x128xf32, #tpu.memory_space<vmem>>, vector<1x8x128xf32>,
    return
  }
  func.func @transform_0(%arg0: i32) -> (i32, i32) {
    %c0_i32 = arith.constant 0 : i32
    %c0_i32_0 = arith.constant 0 : i32
    return %arg0, %c0_i32 : i32, i32
  }
  func.func @transform_1(%arg0: i32) -> (i32, i32, i32) {
    %c0_i32 = arith.constant 0 : i32
    %c0_i32_0 = arith.constant 0 : i32
    %c0_i32_1 = arith.constant 0 : i32
    return %arg0, %c0_i32, %c0_i32_0 : i32, i32, i32
  }
}

</mosaic_0001>

<bundles_post_ra>
// kernel: tpu_custom_call.1
= control target key start
LH: loop header
LB: loop body
LE: loop exit
PB: predicated region body
PF: predicated region fallthrough
CT: control target
= control target key end

     0   :  { %6 = vsyncpa [#allocation3], 0  ;;  %s159_s0 = inlined_call_operand.hbm [shape: f32[13,128], index: 0, kind: input, shape index: {}]   ;;  %s160_s1 = inlined_call_operand.hbm [shape: f32[1,8,128], index: 1, kind: output, shape index: {}]  }
   0x1   :  { %7 = vsyncpa [#allocation4], 0  ;;  %s139_s6 = smov [#allocation2]  }
   0x2   :  { %s13_s7 = sshll.u32 %s139_s6, 4  ;;  %s14_s7 = int_to_ptr.vmem [resolvable:$true] %s13_s7 }
   0x3   :  { %s103_s8 = scalar_lea.vmem %s14_s7, 256  ;;  %p108_p1 = scmp.lt.s32.totalorder %s14_s7, %s14_s7 }
   0x4   :  { %p104_p0 = scmp.ne.s32.totalorder %s14_s7, %s103_s8  ;;  %p109_p2 = scmp.lt.s32.totalorder %s103_s8, %s103_s8 }
   0x6   :  { %p110_p3 = por %p109_p2, %p108_p1 }
   0x8   :  { %p111_p4 = pnand %p110_p3, %p104_p0 }
   0xa   :  { %114 = shalt.err (!%p111_p4)
}
   0xb   :  { %s140_s9 = smov 128   ;;  %s141_s10 = smov 8  }
   0xc   :  { %19 = dma.hbm_to_vmem [thread:$0]  %s159_s0, 256, %s14_s7, [#allocation3], %s140_s9, %s140_s9, %s141_s10  }
   0xd   :  { %135 = dma.done.wait [#allocation3], 256  }
   0xe   :  { %136 = vsyncadd [#allocation3], 4294967040  ;;  %v25_v0 = vlaneseq  ;;  %v23_v3 = vld [vmem:[#allocation2] sm:$0xff]  ;;  %v24_v4 = vld [vmem:[#allocation2 + $0x8] sm:$0x1f]  ;;  %vm50_vm1 = vcmask 1044480  }
   0xf   :  { %v36_v6 = vsub.f32 1.0, %v23_v3  ;;  %v44_v13 = vmul.f32 %v23_v3, %v23_v3  ;;  %s142_s0 = smov [#allocation5]  }
  0x10   :  { %v26_v1 = vshrl.u32 %v25_v0, 7  ;;  %v63_v29 = vand.u32 127, %v25_v0  ;;  %s76_s13 = sshll.u32 %s142_s0, 4  ;;  %s77_s13 = int_to_ptr.vmem [resolvable:$true] %s76_s13 }
  0x11   :  { %91 = vlog2.f32 %v36_v6  ;;  %s115_s15 = scalar_lea.vmem %s77_s13, 128  ;;  %p120_p6 = scmp.lt.s32.totalorder %s77_s13, %s77_s13 }
  0x12   :  { %v27_v2 = vadd.s32 8, %v26_v1  ;;  %vm64_vm2 = vcmp.eq.s32.totalorder %v26_v1, 0  ;;  %vm65_vm3 = vcmp.eq.s32.totalorder %v63_v29, 0  ;;  %p116_p5 = scmp.ne.s32.totalorder %s77_s13, %s115_s15  ;;  %p121_p7 = scmp.lt.s32.totalorder %s115_s15, %s115_s15 }
  0x13   :  { %vm66_vm4 = vmand %vm64_vm2, %vm65_vm3 }
  0x14   :  { %vm33_vm0 = vcmp.lt.s32.totalorder %v27_v2, 13  ;;  %p122_p8 = por %p121_p7, %p120_p6 }
  0x15   :  { %v35_v5 = vsel %vm33_vm0, %v24_v4, 0.0 }
  0x16   :  { %v37_v7 = vsub.f32 1.0, %v35_v5  ;;  %v45_v15 = vmul.f32 %v35_v5, %v35_v5  ;;  %p123_p9 = pnand %p122_p8, %p116_p5 }
  0x18   :  { %93 = vlog2.f32 %v37_v7 }
  0x1e   :  { %v92_v8 = vpop.eup %91 }
  0x1f   :  { %v39_v10 = vmul.f32 0.6931472, %v92_v8 }
  0x21   :  { %v42_v12 = vmax.f32 %v39_v10, -100.0 }
  0x23   :  { %v46_v16 = vsub.f32 0.0, %v42_v12 }
  0x25   :  { %v94_v9 = vpop.eup %93  ;;  %v48_v18 = vmul.f32 %v46_v16, %v44_v13 }
  0x26   :  { %v41_v11 = vmul.f32 0.6931472, %v94_v9 }
  0x28   :  { %v43_v14 = vmax.f32 %v41_v11, -100.0 }
  0x2a   :  { %v47_v17 = vsub.f32 0.0, %v43_v14 }
  0x2c   :  { %v49_v19 = vmul.f32 %v47_v17, %v45_v15 }
  0x2e   :  { %v51_v20 = vsel %vm50_vm1, %v49_v19, 0.0 }
  0x2f   :  { %v52_v21 = vadd.f32 %v51_v20, %v48_v18 }
  0x31   :  { %53 = vadd.xlane.f32.xlu0 %v52_v21 }
  0xba   :  { %v54_v22 = vpop.xlane.xlu0 %53 }
  0xbb   :  { %v55_v23 = vrot.slane %v54_v22, 4 }
  0xbd   :  { %v56_v24 = vadd.f32 %v55_v23, %v54_v22 }
  0xbf   :  { %v57_v25 = vrot.slane %v56_v24, 2 }
  0xc1   :  { %v58_v26 = vadd.f32 %v57_v25, %v56_v24 }
  0xc3   :  { %v59_v27 = vrot.slane %v58_v26, 1 }
  0xc5   :  { %v60_v28 = vadd.f32 %v59_v27, %v58_v26 }
  0xc7   :  { %85 = vpush %v60_v28 }
  0xf8   :  { %s86_s14 = spop %85 }
  0xf9   :  { %v67_v30 = vstv %s86_s14 }
  0xfa   :  { %v68_v31 = vsel %vm66_vm4, %v67_v30, 0.0 }
  0xfb   :  { %69 = vst [vmem:[#allocation5] sm:$0xff] %v68_v31 }
  0xfc   :  { %126 = shalt.err (!%p123_p9)
}
  0xfd   :  { %79 = dma.vmem_to_hbm [thread:$0]  %s77_s13, 128, %s160_s1, [#allocation4]  }
  0xfe   :  { %137 = dma.done.wait [#allocation4], 128  }
  0xff   :  { %138 = vsyncadd [#allocation4], 4294967168 }
 0x100   :  { %83 = vsyncpa [#allocation3], 1 }
 0x101   :  { %84 = vsyncpa [#allocation4], 1 }

</bundles_post_ra>
